<compile_context>
chip_gen: v6e
topology: v6e:2x2x1
jax: 0.10.0
libtpu: 0.0.40
codegen_flags: <defaults>
</compile_context>

<pallas_src>
import functools

import numpy as np

import jax
import jax.numpy as jnp
from jax.experimental import pallas as pl
from jax.experimental.pallas import tpu as pltpu


def _conv3x3_im2col(src, w_ref, b_ref, shifts, hw):
    """3x3 conv (pad=1) of src:(C, HW') as a single MXU matmul.

    `src` is in the zero-column flat layout, so each neighbour tap is one
    circular lane roll and all out-of-image taps read stored zeros — no
    per-tap masking is required.
    """
    pieces = []
    for s in shifts:
        if s == 0:
            pieces.append(src)                                # center tap
        else:
            # shifted[:, p] == src[:, (p + s) % hw]
            pieces.append(pltpu.roll(src, (-s) % hw, axis=1))
    patches = jnp.concatenate(pieces, axis=0)                 # (9*C, HW')
    out = jnp.dot(w_ref[...], patches,
                  preferred_element_type=jnp.float32)         # (C, HW')
    return out + b_ref[...]                                   # bias: (C, 1) bcast


def _basic_block_kernel(x_ref, g_ref, w1_ref, b1_ref, w2_ref, b2_ref, vmask_ref,
                        out_ref, *, shifts, hw):
    """One batch element per grid step.

    x_ref   : (1, C, HW')   input in zero-column flat layout (lane-dense)
    g_ref   : (1, 1, HW')   soft gate mask (same layout)
    w1/w2   : (C, 9*C)      BN-scale-folded conv weights (tap-major, cin-minor)
    b1/b2   : (C, 1)        folded BN biases
    vmask   : (1, HW')      1.0 at real pixels, 0.0 at pad slots
    out_ref : (1, C, HW')
    """
    x = x_ref[0]                                              # (C, HW')
    vmask = vmask_ref[...]                                    # (1, HW')

    # conv1 + BN1 (folded) + ReLU
    act1 = jnp.maximum(
        _conv3x3_im2col(x, w1_ref, b1_ref, shifts, hw), 0.0)
    # Re-zero pad slots so conv2's rolls read zeros at the image borders.
    act1 = act1 * vmask

    # conv2 + BN2 (folded) — act1 stays in vregs, no scratch round trip.
    h = _conv3x3_im2col(act1, w2_ref, b2_ref, shifts, hw)

    # gate blend + identity shortcut + ReLU, fused:
    #   relu(g*h + (1-g)*x + x) == relu(g*h + (2-g)*x)
    g = g_ref[0]                                              # (1, HW')
    out_ref[0] = jnp.maximum(g * h + (2.0 - g) * x, 0.0)


def basic_block_forward(x_nchw, gate_nchw, w1_oihw, b1, w2_oihw, b2):
    """NCHW in / NCHW out. Weights are (Cout, Cin, 3, 3) with BN scale already
    folded in; b1/b2 are the folded BN biases (per output channel)."""
    N, C, H, W = x_nchw.shape
    if C % 8 != 0:
        # TODO(synk): pad channels for non-sublane-aligned channel counts.
        raise ValueError("demo kernel requires C % 8 == 0")

    # Zero-column flat layout: W real pixels + 1 zero column per row, then a
    # zero tail (>= W+2 elements) rounding the flat length to a lane multiple.
    Wp = W + 1
    hw_valid = H * Wp
    HWp = ((hw_valid + W + 2 + 127) // 128) * 128

    def pack_act(a, c):
        a = jnp.pad(a.astype(jnp.float32), ((0, 0), (0, 0), (0, 0), (0, 1)))
        a = a.reshape(N, c, hw_valid)
        return jnp.pad(a, ((0, 0), (0, 0), (0, HWp - hw_valid)))

    x = pack_act(x_nchw, C)                                   # (N, C, HW')
    g = pack_act(gate_nchw, 1)                                # (N, 1, HW')

    # (Cout, 9*Cin) weight matrices, tap-major / cin-minor — matches the
    # im2col patch stacking order inside the kernel.
    def pack_w(w):
        return jnp.transpose(w, (0, 2, 3, 1)).reshape(C, 9 * C).astype(jnp.float32)

    w1m, w2m = pack_w(w1_oihw), pack_w(w2_oihw)
    b1c = b1.reshape(C, 1).astype(jnp.float32)
    b2c = b2.reshape(C, 1).astype(jnp.float32)

    # Host precompute: flat tap shifts in the padded layout and the single
    # valid-pixel mask used to re-zero pad slots between the two convs.
    shifts = tuple((kh - 1) * Wp + (kw - 1)
                   for kh in range(3) for kw in range(3))
    flat = np.arange(HWp)
    vmask = ((flat < hw_valid) & ((flat % Wp) < W)).astype(np.float32)[None, :]
    vmask = jnp.asarray(vmask)                                # (1, HW')

    kernel = functools.partial(_basic_block_kernel, shifts=shifts, hw=HWp)

    out = pl.pallas_call(
        kernel,
        out_shape=jax.ShapeDtypeStruct((N, C, HWp), jnp.float32),
        grid=(N,),
        in_specs=[
            pl.BlockSpec((1, C, HWp), lambda n: (n, 0, 0)),   # x
            pl.BlockSpec((1, 1, HWp), lambda n: (n, 0, 0)),   # gate
            pl.BlockSpec((C, 9 * C), lambda n: (0, 0)),       # w1 (folded)
            pl.BlockSpec((C, 1), lambda n: (0, 0)),           # b1
            pl.BlockSpec((C, 9 * C), lambda n: (0, 0)),       # w2 (folded)
            pl.BlockSpec((C, 1), lambda n: (0, 0)),           # b2
            pl.BlockSpec((1, HWp), lambda n: (0, 0)),         # valid-pixel mask
        ],
        out_specs=pl.BlockSpec((1, C, HWp), lambda n: (n, 0, 0)),
        compiler_params=pltpu.CompilerParams(
            dimension_semantics=("parallel",)),
    )(x, g, w1m, b1c, w2m, b2c, vmask)

    # Strip the per-row pad column and the zero tail.
    out = out[:, :, :hw_valid].reshape(N, C, H, Wp)[:, :, :, :W]
    return out


def _reference(x_nchw, gate_nchw, w1_oihw, b1, w2_oihw, b2):
    """Pure-JAX reference (lax conv, NCHW) with the same folded parameters."""
    def conv3x3(inp, w):
        return jax.lax.conv_general_dilated(
            inp, w, window_strides=(1, 1), padding=((1, 1), (1, 1)),
            dimension_numbers=("NCHW", "OIHW", "NCHW"),
            precision=jax.lax.Precision.HIGHEST)

    C = x_nchw.shape[1]
    h = conv3x3(x_nchw, w1_oihw) + b1.reshape(1, C, 1, 1)
    h = jnp.maximum(h, 0.0)
    h = conv3x3(h, w2_oihw) + b2.reshape(1, C, 1, 1)
    h = gate_nchw * h + (1.0 - gate_nchw) * x_nchw
    return jnp.maximum(h + x_nchw, 0.0)


if __name__ == "__main__":
    N, C, H, W = 2, 8, 16, 16   # in_channels == out_channels -> identity shortcut
    key = jax.random.PRNGKey(0)
    kx, kg, kw1, kw2, ks1, kb1, ks2, kb2 = jax.random.split(key, 8)

    # Inputs (PyTorch NCHW convention).
    x = jax.random.normal(kx, (N, C, H, W), jnp.float32)
    gate = jax.nn.sigmoid(jax.random.normal(kg, (N, 1, H, W), jnp.float32))

    # Conv weights (Cout, Cin, kh, kw), bias=False; BN folded to y = x*s + b.
    w1 = 0.1 * jax.random.normal(kw1, (C, C, 3, 3), jnp.float32)
    w2 = 0.1 * jax.random.normal(kw2, (C, C, 3, 3), jnp.float32)
    s1 = 1.0 + 0.1 * jax.random.normal(ks1, (C,), jnp.float32)
    b1 = 0.1 * jax.random.normal(kb1, (C,), jnp.float32)
    s2 = 1.0 + 0.1 * jax.random.normal(ks2, (C,), jnp.float32)
    b2 = 0.1 * jax.random.normal(kb2, (C,), jnp.float32)

    # Fold BN scale into the conv weights (per output channel) once, on host.
    w1f = w1 * s1[:, None, None, None]
    w2f = w2 * s2[:, None, None, None]

    out = jax.block_until_ready(basic_block_forward(x, gate, w1f, b1, w2f, b2))
    ref = jax.block_until_ready(_reference(x, gate, w1f, b1, w2f, b2))

    assert out.shape == (N, C, H, W) and out.dtype == jnp.float32
    if not jnp.allclose(out, ref, atol=1e-4, rtol=1e-4):
        raise AssertionError("Pallas output mismatch vs JAX reference")
    print("KERNEL_OK")
</pallas_src>

<mosaic_0001>
module attributes {stable_mosaic.version = 11 : i64} {
  func.func @_basic_block_kernel(%arg0: i32, %arg1: memref<1x8x384xf32, #tpu.memory_space<vmem>>, %arg2: memref<1x1x384xf32, #tpu.memory_space<vmem>>, %arg3: memref<8x72xf32, #tpu.memory_space<vmem>>, %arg4: memref<8x1xf32, #tpu.memory_space<vmem>>, %arg5: memref<8x72xf32, #tpu.memory_space<vmem>>, %arg6: memref<8x1xf32, #tpu.memory_space<vmem>>, %arg7: memref<1x384xf32, #tpu.memory_space<vmem>>, %arg8: memref<1x8x384xf32, #tpu.memory_space<vmem>>) attributes {dimension_semantics = [#tpu.dimension_semantics<parallel>], iteration_bounds = array<i64: 2>, scalar_prefetch = 0 : i64, scratch_operands = 0 : i64, tpu.core_type = #tpu.core_type<tc>, window_params = [{transform_indices = @transform_0, window_bounds = array<i64: 1, 8, 384>}, {transform_indices = @transform_1, window_bounds = array<i64: 1, 1, 384>}, {pipeline_mode = #tpu.pipeline_mode<synchronous>, transform_indices = @transform_2, window_bounds = array<i64: 8, 72>}, {pipeline_mode = #tpu.pipeline_mode<synchronous>, transform_indices = @transform_3, window_bounds = array<i64: 8, 1>}, {pipeline_mode = #tpu.pipeline_mode<synchronous>, transform_indices = @transform_4, window_bounds = array<i64: 8, 72>}, {pipeline_mode = #tpu.pipeline_mode<synchronous>, transform_indices = @transform_5, window_bounds = array<i64: 8, 1>}, {pipeline_mode = #tpu.pipeline_mode<synchronous>, transform_indices = @transform_6, window_bounds = array<i64: 1, 384>}, {transform_indices = @transform_7, window_bounds = array<i64: 1, 8, 384>}]} {
    %c0 = arith.constant 0 : index
    %c0_0 = arith.constant 0 : index
    %c0_1 = arith.constant 0 : index
    %0 = vector.load %arg1[%c0, %c0_0, %c0_1] : memref<1x8x384xf32, #tpu.memory_space<vmem>>, vector<1x8x384xf32>
    %1 = vector.shape_cast %0 : vector<1x8x384xf32> to vector<8x384xf32>
    %c0_2 = arith.constant 0 : index
    %c0_3 = arith.constant 0 : index
    %2 = vector.load %arg7[%c0_2, %c0_3] : memref<1x384xf32, #tpu.memory_space<vmem>>, vector<1x384xf32>
    %c18_i32 = arith.constant 18 : i32
    %3 = tpu.dynamic_rotate %1 by %c18_i32 dim 1 : vector<8x384xf32>, i32 -> vector<8x384xf32>
    %c17_i32 = arith.constant 17 : i32
    %4 = tpu.dynamic_rotate %1 by %c17_i32 dim 1 : vector<8x384xf32>, i32 -> vector<8x384xf32>
    %c16_i32 = arith.constant 16 : i32
    %5 = tpu.dynamic_rotate %1 by %c16_i32 dim 1 : vector<8x384xf32>, i32 -> vector<8x384xf32>
    %c1_i32 = arith.constant 1 : i32
    %6 = tpu.dynamic_rotate %1 by %c1_i32 dim 1 : vector<8x384xf32>, i32 -> vector<8x384xf32>
    %c383_i32 = arith.constant 383 : i32
    %7 = tpu.dynamic_rotate %1 by %c383_i32 dim 1 : vector<8x384xf32>, i32 -> vector<8x384xf32>
    %c368_i32 = arith.constant 368 : i32
    %8 = tpu.dynamic_rotate %1 by %c368_i32 dim 1 : vector<8x384xf32>, i32 -> vector<8x384xf32>
    %c367_i32 = arith.constant 367 : i32
    %9 = tpu.dynamic_rotate %1 by %c367_i32 dim 1 : vector<8x384xf32>, i32 -> vector<8x384xf32>
    %c366_i32 = arith.constant 366 : i32
    %10 = tpu.dynamic_rotate %1 by %c366_i32 dim 1 : vector<8x384xf32>, i32 -> vector<8x384xf32>
    %11 = tpu.concatenate %3, %4, %5, %6, %1, %7, %8, %9, %10 in 0 : vector<8x384xf32>, vector<8x384xf32>, vector<8x384xf32>, vector<8x384xf32>, vector<8x384xf32>, vector<8x384xf32>, vector<8x384xf32>, vector<8x384xf32>, vector<8x384xf32> -> vector<72x384xf32>
    %c0_4 = arith.constant 0 : index
    %c0_5 = arith.constant 0 : index
    %12 = vector.load %arg3[%c0_4, %c0_5] : memref<8x72xf32, #tpu.memory_space<vmem>>, vector<8x72xf32>
    %cst = arith.constant dense<0.000000e+00> : vector<8x384xf32>
    %13 = tpu.matmul %12, %11, %cst {dimension_numbers = #tpu.dot_dimension_numbers<[1], [0], [0], [1], [0, 0, 1, 1], [], []>} : vector<8x72xf32>, vector<72x384xf32>, vector<8x384xf32> -> vector<8x384xf32>
    %c0_6 = arith.constant 0 : index
    %c0_7 = arith.constant 0 : index
    %14 = vector.load %arg4[%c0_6, %c0_7] : memref<8x1xf32, #tpu.memory_space<vmem>>, vector<8x1xf32>
    %15 = vector.broadcast %14 : vector<8x1xf32> to vector<8x384xf32>
    %16 = arith.addf %13, %15 : vector<8x384xf32>
    %cst_8 = arith.constant 0.000000e+00 : f32
    %17 = vector.broadcast %cst_8 : f32 to vector<8x384xf32>
    %18 = arith.maximumf %16, %17 : vector<8x384xf32>
    %19 = vector.broadcast %2 : vector<1x384xf32> to vector<8x384xf32>
    %20 = arith.mulf %18, %19 : vector<8x384xf32>
    %c18_i32_9 = arith.constant 18 : i32
    %21 = tpu.dynamic_rotate %20 by %c18_i32_9 dim 1 : vector<8x384xf32>, i32 -> vector<8x384xf32>
    %c17_i32_10 = arith.constant 17 : i32
    %22 = tpu.dynamic_rotate %20 by %c17_i32_10 dim 1 : vector<8x384xf32>, i32 -> vector<8x384xf32>
    %c16_i32_11 = arith.constant 16 : i32
    %23 = tpu.dynamic_rotate %20 by %c16_i32_11 dim 1 : vector<8x384xf32>, i32 -> vector<8x384xf32>
    %c1_i32_12 = arith.constant 1 : i32
    %24 = tpu.dynamic_rotate %20 by %c1_i32_12 dim 1 : vector<8x384xf32>, i32 -> vector<8x384xf32>
    %c383_i32_13 = arith.constant 383 : i32
    %25 = tpu.dynamic_rotate %20 by %c383_i32_13 dim 1 : vector<8x384xf32>, i32 -> vector<8x384xf32>
    %c368_i32_14 = arith.constant 368 : i32
    %26 = tpu.dynamic_rotate %20 by %c368_i32_14 dim 1 : vector<8x384xf32>, i32 -> vector<8x384xf32>
    %c367_i32_15 = arith.constant 367 : i32
    %27 = tpu.dynamic_rotate %20 by %c367_i32_15 dim 1 : vector<8x384xf32>, i32 -> vector<8x384xf32>
    %c366_i32_16 = arith.constant 366 : i32
    %28 = tpu.dynamic_rotate %20 by %c366_i32_16 dim 1 : vector<8x384xf32>, i32 -> vector<8x384xf32>
    %29 = tpu.concatenate %21, %22, %23, %24, %20, %25, %26, %27, %28 in 0 : vector<8x384xf32>, vector<8x384xf32>, vector<8x384xf32>, vector<8x384xf32>, vector<8x384xf32>, vector<8x384xf32>, vector<8x384xf32>, vector<8x384xf32>, vector<8x384xf32> -> vector<72x384xf32>
    %c0_17 = arith.constant 0 : index
    %c0_18 = arith.constant 0 : index
    %30 = vector.load %arg5[%c0_17, %c0_18] : memref<8x72xf32, #tpu.memory_space<vmem>>, vector<8x72xf32>
    %cst_19 = arith.constant dense<0.000000e+00> : vector<8x384xf32>
    %31 = tpu.matmul %30, %29, %cst_19 {dimension_numbers = #tpu.dot_dimension_numbers<[1], [0], [0], [1], [0, 0, 1, 1], [], []>} : vector<8x72xf32>, vector<72x384xf32>, vector<8x384xf32> -> vector<8x384xf32>
    %c0_20 = arith.constant 0 : index
    %c0_21 = arith.constant 0 : index
    %32 = vector.load %arg6[%c0_20, %c0_21] : memref<8x1xf32, #tpu.memory_space<vmem>>, vector<8x1xf32>
    %33 = vector.broadcast %32 : vector<8x1xf32> to vector<8x384xf32>
    %34 = arith.addf %31, %33 : vector<8x384xf32>
    %c0_22 = arith.constant 0 : index
    %c0_23 = arith.constant 0 : index
    %c0_24 = arith.constant 0 : index
    %35 = vector.load %arg2[%c0_22, %c0_23, %c0_24] : memref<1x1x384xf32, #tpu.memory_space<vmem>>, vector<1x1x384xf32>
    %36 = vector.shape_cast %35 : vector<1x1x384xf32> to vector<1x384xf32>
    %37 = vector.broadcast %36 : vector<1x384xf32> to vector<8x384xf32>
    %38 = arith.mulf %37, %34 : vector<8x384xf32>
    %cst_25 = arith.constant 2.000000e+00 : f32
    %39 = vector.broadcast %cst_25 : f32 to vector<1x384xf32>
    %40 = arith.subf %39, %36 : vector<1x384xf32>
    %41 = vector.broadcast %40 : vector<1x384xf32> to vector<8x384xf32>
    %42 = arith.mulf %41, %1 : vector<8x384xf32>
    %43 = arith.addf %38, %42 : vector<8x384xf32>
    %cst_26 = arith.constant 0.000000e+00 : f32
    %44 = vector.broadcast %cst_26 : f32 to vector<8x384xf32>
    %45 = arith.maximumf %43, %44 : vector<8x384xf32>
    %c0_27 = arith.constant 0 : index
    %c0_28 = arith.constant 0 : index
    %c0_29 = arith.constant 0 : index
    %46 = vector.load %arg8[%c0_27, %c0_28, %c0_29] : memref<1x8x384xf32, #tpu.memory_space<vmem>>, vector<1x8x384xf32>
    %47 = vector.shape_cast %46 : vector<1x8x384xf32> to vector<8x384xf32>
    %48 = vector.shape_cast %45 : vector<8x384xf32> to vector<1x8x384xf32>
    tpu.vector_store %arg8[%c0_27, %c0_28, %c0_29], %48 {strides = array<i32>} : memref<1x8x384xf32, #tpu.memory_space<vmem>>, vector<1x8x384xf32>,
    return
  }
  func.func @transform_0(%arg0: i32) -> (i32, i32, i32) {
    %c0_i32 = arith.constant 0 : i32
    %c0_i32_0 = arith.constant 0 : i32
    %c0_i32_1 = arith.constant 0 : i32
    return %arg0, %c0_i32, %c0_i32_0 : i32, i32, i32
  }
  func.func @transform_1(%arg0: i32) -> (i32, i32, i32) {
    %c0_i32 = arith.constant 0 : i32
    %c0_i32_0 = arith.constant 0 : i32
    %c0_i32_1 = arith.constant 0 : i32
    return %arg0, %c0_i32, %c0_i32_0 : i32, i32, i32
  }
  func.func @transform_2(%arg0: i32) -> (i32, i32) {
    %c0_i32 = arith.constant 0 : i32
    %c0_i32_0 = arith.constant 0 : i32
    %c0_i32_1 = arith.constant 0 : i32
    return %c0_i32, %c0_i32_0 : i32, i32
  }
  func.func @transform_3(%arg0: i32) -> (i32, i32) {
    %c0_i32 = arith.constant 0 : i32
    %c0_i32_0 = arith.constant 0 : i32
    %c0_i32_1 = arith.constant 0 : i32
    return %c0_i32, %c0_i32_0 : i32, i32
  }
  func.func @transform_4(%arg0: i32) -> (i32, i32) {
    %c0_i32 = arith.constant 0 : i32
    %c0_i32_0 = arith.constant 0 : i32
    %c0_i32_1 = arith.constant 0 : i32
    return %c0_i32, %c0_i32_0 : i32, i32
  }
  func.func @transform_5(%arg0: i32) -> (i32, i32) {
    %c0_i32 = arith.constant 0 : i32
    %c0_i32_0 = arith.constant 0 : i32
    %c0_i32_1 = arith.constant 0 : i32
    return %c0_i32, %c0_i32_0 : i32, i32
  }
  func.func @transform_6(%arg0: i32) -> (i32, i32) {
    %c0_i32 = arith.constant 0 : i32
    %c0_i32_0 = arith.constant 0 : i32
    %c0_i32_1 = arith.constant 0 : i32
    return %c0_i32, %c0_i32_0 : i32, i32
  }
  func.func @transform_7(%arg0: i32) -> (i32, i32, i32) {
    %c0_i32 = arith.constant 0 : i32
    %c0_i32_0 = arith.constant 0 : i32
    %c0_i32_1 = arith.constant 0 : i32
    return %arg0, %c0_i32, %c0_i32_0 : i32, i32, i32
  }
}

</mosaic_0001>

<bundles_post_ra>
// kernel: tpu_custom_call.1
= control target key start
LH: loop header
LB: loop body
LE: loop exit
PB: predicated region body
PF: predicated region fallthrough
CT: control target
= control target key end

     0   :  { %s1754_s0 = inlined_call_operand.hbm [shape: f32[2,8,384], index: 0, kind: input, shape index: {}]   ;;  %s1755_s1 = inlined_call_operand.hbm [shape: f32[2,1,384], index: 1, kind: input, shape index: {}]   ;;  %s1756_s2 = inlined_call_operand.vmem [shape: f32[8,72], index: 2, kind: input, shape index: {}]   ;;  %s1757_s3 = inlined_call_operand.vmem [shape: f32[8,1], index: 3, kind: input, shape index: {}]   ;;  %s1758_s4 = inlined_call_operand.vmem [shape: f32[8,72], index: 4, kind: input, shape index: {}]   ;;  %s1759_s5 = inlined_call_operand.vmem [shape: f32[8,1], index: 5, kind: input, shape index: {}]   ;;  %s1760_s6 = inlined_call_operand.vmem [shape: f32[1,384], index: 6, kind: input, shape index: {}]   ;;  %s1761_s7 = inlined_call_operand.hbm [shape: f32[2,8,384], index: 7, kind: output, shape index: {}]  }
   0x1   :  { %1764 = sst [smem:[#allocation12_spill]] %s1754_s0 }
   0x2   :  { %12 = vsyncpa [#allocation3], 0 }
   0x3   :  { %14 = vsyncpa [#allocation3 + $0x1], 0 }
   0x4   :  { %15 = vsyncpa [#allocation6], 0 }
   0x5   :  { %17 = vsyncpa [#allocation6 + $0x1], 0 }
   0x6   :  { %18 = vsyncpa [#allocation4], 0 }
   0x7   :  { %20 = vsyncpa [#allocation4 + $0x1], 0  ;;  %s1298_s24 = smov 0   ;;  %s1300_s25 = smov 0  }
   0x8   :  { %s1302_s26 = smov 0   ;;  %s1304_s27 = smov 0  }
   0x9 LB: > { %s1319_s28 = sadd.s32 4294967295, %s1242_s27   ;;  %s973_s29 = sadd.s32 4294967294, %s1242_s27   ;;  %s1242_s27 = sphi %s1304_s27, %s1783_s27   ;;  %s1238_s26 = sphi %s1302_s26, %s1782_s26   ;;  %s1234_s25 = sphi %s1300_s25, %s1781_s25   ;;  %s1230_s24 = sphi %s1298_s24, %s1780_s24  }
   0xa   : > { %s1323_s30 = sadd.s32 1, %s1242_s27   ;;  %s33_s8 = sadd.s32 1, %s1238_s26 }
   0xb   : > { %s30_s9 = ssub.s32 %s1242_s27, %s1323_s30  ;;  %p40_p0 = scmp.ne.s32.totalorder %s1238_s26, %s1234_s25 }
   0xc   : > { %p31_p1 = scmp.eq.s32.totalorder %s30_s9, 0  ;;  %p41_p2 = scmp.eq.s32.totalorder %s1242_s27, 0 }
   0xd   : > { %p46_p3 = scmp.ne.s32.totalorder %s1234_s25, %s1230_s24  ;;  %p47_p4 = scmp.eq.s32.totalorder %s1319_s28, 0 }
   0xe   : > { %s1335_s10 = scalar_select %p31_p1, %s1238_s26, %s33_s8  }
   0xf   : > { %p42_p5 = por %p41_p2, %p40_p0  ;;  %p1337_p6 = por %p47_p4, %p46_p3 }
  0x10   : > { %1765 = sst [smem:[#allocation11_spill]] %s1335_s10  ;;  %p201_p7 = scmp.eq.s32.totalorder %s1319_s28, 1 }
  0x11   : > { %s1766_s11 = scalar_select %p1337_p6, 1, 0 }
  0x12   : > { %p207_p8 = scmp.eq.s32.totalorder %s973_s29, 1  ;;  %p1072_p10 = scmp.lt.s32.totalorder %s1242_s27, 2 }
  0x13   : > { %p1344_p11 = por %p201_p7, %p40_p0  ;;  %s1353_s14 = sand.u32 1, %s1238_s26  }
  0x14   : > { %p1348_p12 = por %p207_p8, %p46_p3  ;;  %s1049_s15 = smul.u32 384, %s1242_s27 }
  0x15   : > { %s1767_s12 = scalar_select %p1344_p11, 1, 0 }
  0x16   : > { %s1768_s13 = scalar_select %p1348_p12, 1, 0 }
  0x17   : > { %s1048_s16 = smul.u32 24, %s1353_s14  ;;  %s1769_s0 = sld [smem:[#allocation12_spill]] }
  0x18   : > { %p1362_p13 = pnand %p1072_p10, %p42_p5  ;;  %s243_s23 = scalar_lea.sflag [#allocation3], %s1353_s14 }
  0x19   : > { %s246_s21 = scalar_lea.vmem [#allocation2], %s1048_s16 }
  0x1a   : > { %s254_s22 = sshll.u32 %s246_s21, 4  ;;  %p1120_p3 = pneg %p1362_p13  ;;  %s255_s22 = int_to_ptr.vmem [resolvable:$true] %s254_s22 }
  0x1d   : > { %s1360_s19 = scalar_lea.hbm %s1769_s0, %s1049_s15  ;;  %s1123_s15 = scalar_lea.hbm %s1769_s0, 768 }
  0x1e   : > { %s1118_s29 = scalar_lea.hbm %s1360_s19, 384  ;;  %p1124_p5 = scmp.lt.s32.totalorder %s1360_s19, %s1769_s0 }
  0x1f   : > { %p1119_p2 = scmp.ne.s32.totalorder %s1360_s19, %s1118_s29  ;;  %p1125_p8 = scmp.lt.s32.totalorder %s1123_s15, %s1118_s29 }
  0x21   : > { %p1121_p4 = pnand %p1120_p3, %p1119_p2  ;;  %p1126_p10 = por %p1125_p8, %p1124_p5 }
  0x23   : > { %p1122_p7 = pneg %p1121_p4 }
  0x25   : > { %p1127_p9 = pnand %p1126_p10, %p1122_p7 }
  0x27   : > { %1130 = shalt.err (!%p1127_p9)
}
  0x28   : > { %s1131_s16 = scalar_lea.vmem %s255_s22, 384  ;;  %s1244_s21 = smov [#allocation2]  }
  0x29   : > { %p1132_p0 = scmp.ne.s32.totalorder %s255_s22, %s1131_s16  ;;  %s1136_s10 = sshll.u32 %s1244_s21, 4  ;;  %s1137_s10 = int_to_ptr.vmem [resolvable:$false] %s1136_s10 }
  0x2a   : > { %s1138_s8 = scalar_lea.vmem %s1137_s10, 768  ;;  %p1139_p4 = scmp.lt.s32.totalorder %s255_s22, %s1137_s10 }
  0x2b   : > { %p1134_p1 = pnand %p1132_p0, %p1120_p3  ;;  %p1140_p12 = scmp.lt.s32.totalorder %s1138_s8, %s1131_s16 }
  0x2d   : > { %p1135_p2 = pneg %p1134_p1  ;;  %p1141_p11 = por %p1140_p12, %p1139_p4 }
  0x2f   : > { %p1142_p6 = pnand %p1141_p11, %p1135_p2 }
  0x31   : > { %1145 = shalt.err (!%p1142_p6)
}
  0x32   : > { %1064 = dma.hbm_to_vmem [thread:$0]  (!%p1362_p13), %s1360_s19, 384, %s255_s22, %s243_s23  }
  0x33   : > { %p1771_p9 = scmp.lt.s32.totalorder %s1242_s27, 3  ;;  %p1772_p0 = scmp.ge.s32.totalorder %s1242_s27, 1 }
  0x34   : > { %s1050_s10 = smul.u32 3, %s1353_s14  ;;  %s262_s19 = scalar_lea.sflag [#allocation6], %s1353_s14 }
  0x35   : > { %p1393_p1 = pnand %p1772_p0, %p1771_p9  ;;  %s1051_s9 = smul.u32 48, %s1242_s27 }
  0x36   : > { %s265_s16 = scalar_lea.vmem [#allocation5], %s1050_s10  ;;  %s1151_s0 = scalar_lea.hbm %s1755_s1, 96 }
  0x37   : > { %s1773_s29 = scalar_select %p1393_p1, 1, 0 }
  0x38   : > { %s1402_s18 = scalar_lea.hbm %s1755_s1, %s1051_s9  ;;  %s273_s21 = sshll.u32 %s265_s16, 4  ;;  %s274_s21 = int_to_ptr.vmem [resolvable:$true] %s273_s21 }
  0x39   : > { %s1146_s22 = scalar_lea.hbm %s1402_s18, 48  ;;  %p1152_p7 = scmp.lt.s32.totalorder %s1402_s18, %s1755_s1 }
  0x3a   : > { %p1147_p6 = scmp.ne.s32.totalorder %s1402_s18, %s1146_s22  ;;  %p1153_p5 = scmp.lt.s32.totalorder %s1151_s0, %s1146_s22 }
  0x3c   : > { %p1149_p11 = pnand %p1147_p6, %p1120_p3  ;;  %p1154_p8 = por %p1153_p5, %p1152_p7 }
  0x3e   : > { %p1150_p12 = pneg %p1149_p11 }
  0x40   : > { %p1155_p10 = pnand %p1154_p8, %p1150_p12 }
  0x42   : > { %1158 = shalt.err (!%p1155_p10)
}
  0x43   : > { %s1159_s10 = scalar_lea.vmem %s274_s21, 48  ;;  %s1245_s14 = smov [#allocation5]  }
  0x44   : > { %p1160_p2 = scmp.ne.s32.totalorder %s274_s21, %s1159_s10  ;;  %s1164_s17 = sshll.u32 %s1245_s14, 4  ;;  %s1165_s17 = int_to_ptr.vmem [resolvable:$false] %s1164_s17 }
  0x45   : > { %s1166_s16 = scalar_lea.vmem %s1165_s17, 96  ;;  %p1167_p0 = scmp.lt.s32.totalorder %s274_s21, %s1165_s17 }
  0x46   : > { %p1162_p4 = pnand %p1160_p2, %p1120_p3  ;;  %p1168_p6 = scmp.lt.s32.totalorder %s1166_s16, %s1159_s10 }
  0x48   : > { %p1163_p9 = pneg %p1162_p4  ;;  %p1169_p11 = por %p1168_p6, %p1167_p0 }
  0x4a   : > { %p1170_p1 = pnand %p1169_p11, %p1163_p9 }
  0x4c   : > { %1173 = shalt.err (!%p1170_p1)
}
  0x4d   : > { %1067 = dma.hbm_to_vmem [thread:$0]  (!%p1362_p13), %s1402_s18, 48, %s274_s21, %s262_s19  }
  0x4e   : > { %p1774_p12 = scmp.ne.s32.totalorder %s1773_s29, 0 }
  0x4f   : > { %s1426_s0 = sand.u32 (!%p1774_p12), 1, %s1234_s25   ;;  %p1775_p3 = scmp.ne.s32.totalorder (!%p1774_p12), %s1766_s11, 0 }
  0x50   : > { %282 = sbr.rel (%p1774_p12) target bundleno = 833 (0x341), region = 48  ;;  %s285_s23 = scalar_lea.sflag (!%p1774_p12), [#allocation3], %s1426_s0 }
  0x51   : > { %s1052_s22 = smul.u32 (!%p1774_p12), 24, %s1426_s0 }
  0x53   : > { %s288_s8 = scalar_lea.vmem (!%p1774_p12), [#allocation2], %s1052_s22 }
  0x55   : > { %1217 = dma.done.wait (%p1775_p3), %s285_s23, 384  }
  0x56   : > { %1219 = vsyncadd (%p1775_p3), %s285_s23, 4294966912  ;;  %s1053_s20 = smul.u32 3, %s1426_s0  ;;  %s294_s29 = scalar_lea.sflag [#allocation6], %s1426_s0 }
  0x58   : > { %s1438_s18 = scalar_lea.vmem [#allocation5], %s1053_s20 }
  0x59   : > { %1221 = dma.done.wait (%p1775_p3), %s294_s29, 48  }
  0x5a   : > { %1223 = vsyncadd (%p1775_p3), %s294_s29, 4294967248  ;;  %v1246_v0 = vmov 0.0   ;;  %v1446_v1 = vld [vmem:[%s288_s8 + $0x8] sm:$0xff]  ;;  %v1448_v2 = vld [vmem:[%s288_s8] sm:$0xff]  ;;  %s1247_s21 = smov 110   ;;  %s1248_s11 = smov 111   ;;  %v343_v6 = vlaneseq }
  0x5b   : > { %1006 = vmatprep.subr.mxu1 %v1246_v0  ;;  %494 = vmatprep.mubr.f32.mxu0 %v1246_v0  ;;  %v1454_v3 = vld [vmem:[%s288_s8 + $0x10] sm:$0xff]  ;;  %s1249_s19 = smov 112   ;;  %s1250_s15 = smov 127   ;;  %vm1253_vm0 = vmmov 0   ;;  %v1254_v4 = vmov 0   ;;  %v420_v5 = vld [vmem:[%s1757_s3] sm:$0xff] }
  0x5c   : > { %411 = vrot.lane.b32.xlu0 %v1446_v1, %s1247_s21  ;;  %409 = vrot.lane.b32.xlu1 %v1448_v2, %s1247_s21  ;;  %s1251_s9 = smov 1   ;;  %s1252_s10 = smov 16   ;;  %v1506_v7 = vand.u32 127, %v343_v6  ;;  %v419_v53 = vld [vmem:[%s1756_s2] sm:$0xff]  ;;  %vm426_vm9 = vcmask 588800   ;;  %v576_v57 = vshrl.u32 %v343_v6, 7 }
  0x5d   : > { %1024 = vmatprep.mubr.msk.f32.mxu1 %vm1253_vm0, %v1246_v0  ;;  %1117 = vset.pattern.permute.xlu0 %v1254_v4  ;;  %s1255_s14 = smov 17   ;;  %s1256_s17 = smov 18   ;;  %v336_v60 = vld [vmem:[%s1760_s6] sm:$0x7] }
  0x5e   : > { %vm415_vm1 = vcmp.lt.s32.totalorder %v1506_v7, 110  ;;  %vm405_vm2 = vcmp.lt.s32.totalorder %v1506_v7, 111  ;;  %vm395_vm3 = vcmp.lt.s32.totalorder %v1506_v7, 112  ;;  %vm385_vm4 = vcmp.lt.s32.totalorder %v1506_v7, 127  ;;  %s866_s8 = scalar_lea.sflag [#allocation4], %s1426_s0  ;;  %p1776_p1 = scmp.ne.s32.totalorder %s1767_s12, 0 }
  0x5f   : > { %vm375_vm5 = vcmp.lt.s32.totalorder %v1506_v7, 1  ;;  %vm365_vm6 = vcmp.lt.s32.totalorder %v1506_v7, 16  ;;  %vm355_vm7 = vcmp.lt.s32.totalorder %v1506_v7, 17  ;;  %vm345_vm8 = vcmp.lt.s32.totalorder %v1506_v7, 18 }
  0x60   : > { %413 = vrot.lane.b32.xlu0 %v1454_v3, %s1247_s21  ;;  %401 = vrot.lane.b32.xlu1 %v1446_v1, %s1248_s11  ;;  %v1585_v58 = vsub.s32 2, %v576_v57 }
  0x62   : > { %v586_v63 = vrot.slane %v336_v60, %v1585_v58 }
  0x64   : > { %403 = vrot.lane.b32.xlu0 %v1454_v3, %s1248_s11  ;;  %399 = vrot.lane.b32.xlu1 %v1448_v2, %s1248_s11 }
  0x68   : > { %391 = vrot.lane.b32.xlu0 %v1446_v1, %s1249_s19  ;;  %393 = vrot.lane.b32.xlu1 %v1454_v3, %s1249_s19 }
  0x6c   : > { %389 = vrot.lane.b32.xlu0 %v1448_v2, %s1249_s19  ;;  %381 = vrot.lane.b32.xlu1 %v1446_v1, %s1250_s15 }
  0x70   : > { %383 = vrot.lane.b32.xlu0 %v1454_v3, %s1250_s15  ;;  %379 = vrot.lane.b32.xlu1 %v1448_v2, %s1250_s15 }
  0x74   : > { %369 = vrot.lane.b32.xlu0 %v1448_v2, %s1251_s9  ;;  %371 = vrot.lane.b32.xlu1 %v1446_v1, %s1251_s9 }
  0x78   : > { %373 = vrot.lane.b32.xlu0 %v1454_v3, %s1251_s9  ;;  %359 = vrot.lane.b32.xlu1 %v1448_v2, %s1252_s10 }
  0x7c   : > { %361 = vrot.lane.b32.xlu0 %v1446_v1, %s1252_s10  ;;  %363 = vrot.lane.b32.xlu1 %v1454_v3, %s1252_s10 }
  0x80   : > { %349 = vrot.lane.b32.xlu0 %v1448_v2, %s1255_s14  ;;  %351 = vrot.lane.b32.xlu1 %v1446_v1, %s1255_s14 }
  0x84   : > { %353 = vrot.lane.b32.xlu0 %v1454_v3, %s1255_s14  ;;  %337 = vrot.lane.b32.xlu1 %v1448_v2, %s1256_s17 }
  0x88   : > { %339 = vrot.lane.b32.xlu0 %v1446_v1, %s1256_s17  ;;  %341 = vrot.lane.b32.xlu1 %v1454_v3, %s1256_s17 }
  0x8c   : > { %423 = vperm.xlu0 %1117, %v420_v5  }
  0xce   : > { %v412_v8 = vpop.permute.xlu0 %411  ;;  %v410_v9 = vpop.permute.xlu1 %409 }
  0xcf   : > { %v417_v14 = vsel %vm415_vm1, %v410_v9, %v412_v8 }
  0xd2   : > { %v414_v10 = vpop.permute.xlu0 %413  ;;  %v402_v11 = vpop.permute.xlu1 %401 }
  0xd3   : > { %v416_v12 = vsel %vm415_vm1, %v412_v8, %v414_v10  ;;  %v418_v13 = vsel %vm415_vm1, %v414_v10, %v410_v9  ;;  %v1593_v10 = vsub.s32 0, %v576_v57 }
  0xd4   : > { %444 = vmatprep.subr.mxu0 %v416_v12  ;;  %1007 = vmatpush3.msra.mxu1 %v418_v13 }
  0xd5   : > { %445 = vmatpush1.msra.mxu0 %v417_v14  ;;  %1008 = vmatprep.subr.mxu1 %v1246_v0  ;;  %v578_v12 = vrot.slane %v336_v60, %v1593_v10 }
  0xd6   : > { %v404_v15 = vpop.permute.xlu0 %403  ;;  %v400_v16 = vpop.permute.xlu1 %399 }
  0xd7   : > { %v406_v17 = vsel %vm405_vm2, %v402_v11, %v404_v15  ;;  %v408_v18 = vsel %vm405_vm2, %v404_v15, %v400_v16  ;;  %v407_v19 = vsel %vm405_vm2, %v400_v16, %v402_v11  ;;  %v1606_v16 = vsub.s32 1, %v576_v57 }
  0xd8   : > { %446 = vmatprep.subr.mxu0 %v406_v17  ;;  %1009 = vmatpush3.msra.mxu1 %v408_v18 }
  0xd9   : > { %447 = vmatpush1.msra.mxu0 %v407_v19  ;;  %1010 = vmatprep.subr.mxu1 %v1246_v0  ;;  %v582_v18 = vrot.slane %v336_v60, %v1606_v16 }
  0xda   : > { %v392_v20 = vpop.permute.xlu0 %391  ;;  %v394_v21 = vpop.permute.xlu1 %393 }
  0xdb   : > { %v396_v22 = vsel %vm395_vm3, %v392_v20, %v394_v21 }
  0xdc   : > { %448 = vmatprep.subr.mxu0 %v396_v22 }
  0xde   : > { %v390_v23 = vpop.permute.xlu0 %389  ;;  %v382_v24 = vpop.permute.xlu1 %381 }
  0xdf   : > { %v397_v25 = vsel %vm395_vm3, %v390_v23, %v392_v20  ;;  %v398_v26 = vsel %vm395_vm3, %v394_v21, %v390_v23  ;;  %v666_v20 = vld [vmem:[%s1759_s5] sm:$0xff] }
  0xe0   : > { %449 = vmatpush1.msra.mxu0 %v397_v25  ;;  %1011 = vmatpush3.msra.mxu1 %v398_v26 }
  0xe1   : > { %1012 = vmatprep.subr.mxu1 %v1246_v0 }
  0xe2   : > { %v384_v27 = vpop.permute.xlu0 %383  ;;  %v380_v28 = vpop.permute.xlu1 %379 }
  0xe3   : > { %v386_v29 = vsel %vm385_vm4, %v382_v24, %v384_v27  ;;  %v388_v30 = vsel %vm385_vm4, %v384_v27, %v380_v28  ;;  %v387_v31 = vsel %vm385_vm4, %v380_v28, %v382_v24 }
  0xe4   : > { %450 = vmatprep.subr.mxu0 %v386_v29  ;;  %1013 = vmatpush3.msra.mxu1 %v388_v30 }
  0xe5   : > { %451 = vmatpush1.msra.mxu0 %v387_v31  ;;  %1014 = vmatprep.subr.mxu1 %v1246_v0 }
  0xe6   : > { %v370_v32 = vpop.permute.xlu0 %369  ;;  %452 = vmatprep.subr.mxu0 %v1446_v1  ;;  %v372_v33 = vpop.permute.xlu1 %371  ;;  %1015 = vmatpush3.msra.mxu1 %v1454_v3 }
  0xe7   : > { %453 = vmatpush1.msra.mxu0 %v1448_v2  ;;  %v377_v34 = vsel %vm375_vm5, %v370_v32, %v372_v33  ;;  %1016 = vmatprep.subr.mxu1 %v1246_v0 }
  0xe8   : > { %454 = vmatprep.subr.mxu0 %v377_v34 }
  0xea   : > { %v374_v35 = vpop.permute.xlu0 %373  ;;  %v360_v36 = vpop.permute.xlu1 %359 }
  0xeb   : > { %v378_v37 = vsel %vm375_vm5, %v374_v35, %v370_v32  ;;  %v376_v38 = vsel %vm375_vm5, %v372_v33, %v374_v35 }
  0xec   : > { %455 = vmatpush1.msra.mxu0 %v378_v37  ;;  %1017 = vmatpush3.msra.mxu1 %v376_v38 }
  0xed   : > { %1018 = vmatprep.subr.mxu1 %v1246_v0 }
  0xee   : > { %v362_v39 = vpop.permute.xlu0 %361  ;;  %v364_v40 = vpop.permute.xlu1 %363 }
  0xef   : > { %v367_v41 = vsel %vm365_vm6, %v360_v36, %v362_v39  ;;  %v366_v42 = vsel %vm365_vm6, %v362_v39, %v364_v40  ;;  %v368_v43 = vsel %vm365_vm6, %v364_v40, %v360_v36 }
  0xf0   : > { %456 = vmatprep.subr.mxu0 %v367_v41  ;;  %1019 = vmatpush3.msra.mxu1 %v366_v42 }
  0xf1   : > { %457 = vmatpush1.msra.mxu0 %v368_v43  ;;  %1020 = vmatprep.subr.mxu1 %v1246_v0 }
  0xf2   : > { %v350_v44 = vpop.permute.xlu0 %349  ;;  %v352_v45 = vpop.permute.xlu1 %351 }
  0xf3   : > { %v357_v46 = vsel %vm355_vm7, %v350_v44, %v352_v45 }
  0xf4   : > { %458 = vmatprep.subr.mxu0 %v357_v46 }
  0xf6   : > { %v354_v47 = vpop.permute.xlu0 %353  ;;  %v338_v48 = vpop.permute.xlu1 %337 }
  0xf7   : > { %v358_v49 = vsel %vm355_vm7, %v354_v47, %v350_v44  ;;  %v356_v50 = vsel %vm355_vm7, %v352_v45, %v354_v47 }
  0xf8   : > { %459 = vmatpush1.msra.mxu0 %v358_v49  ;;  %1021 = vmatpush3.msra.mxu1 %v356_v50 }
  0xf9   : > { %1022 = vmatprep.subr.mxu1 %v1246_v0 }
  0xfa   : > { %v340_v51 = vpop.permute.xlu0 %339  ;;  %v342_v52 = vpop.permute.xlu1 %341 }
  0xfb   : > { %v347_v54 = vsel %vm345_vm8, %v338_v48, %v340_v51  ;;  %v346_v55 = vsel %vm345_vm8, %v340_v51, %v342_v52  ;;  %v348_v56 = vsel %vm345_vm8, %v342_v52, %v338_v48 }
  0xfc   : > { %460 = vmatprep.subr.mxu0 %v347_v54  ;;  %1023 = vmatpush3.msra.mxu1 %v346_v55 }
  0xfd   : > { %461 = vmatpush1.msra.mxu0 %v348_v56  ;;  %1025 = vmatmul.mubr.msk.f32.vlgmr.msra.gmra.mxu1 %vm426_vm9, %v419_v53 }
  0xfe   : > { %979 = vmatmul.mubr.msk.f32.vlgmr.msra.gmra.mxu0 %vm426_vm9, %v419_v53  ;;  %1027 = vmatprep.subr.mxu1 %v1246_v0 }
  0xff   : > { %739 = vmatprep.mubr.f32.mxu0 %v1246_v0  ;;  %1045 = vmatprep.mubr.msk.f32.mxu1 %vm1253_vm0, %v1246_v0 }
 0x107   : > { %v424_v59 = vpop.permute.xlu0 %423 }
 0x1bd   : > { %v567_v61 = vpop.f32.mrf.mxu1 }
 0x1be   : > { %v568_v62 = vadd.f32 %v567_v61, %v424_v59  ;;  %v496_v9 = vpop.f32.mrf.mxu0 }
 0x1bf   : > { %v1026_v4 = vpop.f32.mrf.mxu1  ;;  %v497_v6 = vadd.f32 %v496_v9, %v424_v59 }
 0x1c0   : > { %v573_v5 = vmax.f32 %v568_v62, 0.0  ;;  %v498_v14 = vpop.f32.mrf.mxu0 }
 0x1c1   : > { %v571_v11 = vmax.f32 %v497_v6, 0.0  ;;  %v499_v15 = vadd.f32 %v498_v14, %v424_v59  ;;  %v665_v6 = vld [vmem:[%s1758_s4] sm:$0xff] }
 0x1c2   : > { %v592_v8 = vmul.f32 %v586_v63, %v573_v5 }
 0x1c3   : > { %v1600_v13 = vmul.f32 %v578_v12, %v571_v11  ;;  %v572_v17 = vmax.f32 %v499_v15, 0.0 }
 0x1c4   : > { %651 = vrot.lane.b32.xlu0 %v592_v8, %s1248_s11  ;;  %660 = vrot.lane.b32.xlu1 %v592_v8, %s1247_s21 }
 0x1c5   : > { %v1617_v19 = vmul.f32 %v582_v18, %v572_v17 }
 0x1c8   : > { %633 = vrot.lane.b32.xlu0 %v592_v8, %s1250_s15  ;;  %642 = vrot.lane.b32.xlu1 %v592_v8, %s1249_s19 }
 0x1cc   : > { %624 = vrot.lane.b32.xlu0 %v592_v8, %s1251_s9  ;;  %615 = vrot.lane.b32.xlu1 %v592_v8, %s1252_s10 }
 0x1d0   : > { %656 = vrot.lane.b32.xlu0 %v1600_v13, %s1247_s21  ;;  %647 = vrot.lane.b32.xlu1 %v1600_v13, %s1248_s11 }
 0x1d4   : > { %638 = vrot.lane.b32.xlu0 %v1600_v13, %s1249_s19  ;;  %629 = vrot.lane.b32.xlu1 %v1600_v13, %s1250_s15 }
 0x1d8   : > { %620 = vrot.lane.b32.xlu0 %v1600_v13, %s1251_s9  ;;  %611 = vrot.lane.b32.xlu1 %v1600_v13, %s1252_s10 }
 0x1dc   : > { %602 = vrot.lane.b32.xlu0 %v1600_v13, %s1255_s14  ;;  %658 = vrot.lane.b32.xlu1 %v1617_v19, %s1247_s21 }
 0x1e0   : > { %640 = vrot.lane.b32.xlu0 %v1617_v19, %s1249_s19  ;;  %649 = vrot.lane.b32.xlu1 %v1617_v19, %s1248_s11 }
 0x1e4   : > { %606 = vrot.lane.b32.xlu0 %v592_v8, %s1255_s14  ;;  %593 = vrot.lane.b32.xlu1 %v1600_v13, %s1256_s17 }
 0x1e8   : > { %613 = vrot.lane.b32.xlu0 %v1617_v19, %s1252_s10  ;;  %631 = vrot.lane.b32.xlu1 %v1617_v19, %s1250_s15 }
 0x1ec   : > { %595 = vrot.lane.b32.xlu0 %v1617_v19, %s1256_s17  ;;  %622 = vrot.lane.b32.xlu1 %v1617_v19, %s1251_s9  ;;  %s332_s9 = scalar_lea.vmem [#allocation7], %s1052_s22 }
 0x1ed   : > { %s880_s10 = sshll.u32 %s332_s9, 4  ;;  %s881_s10 = int_to_ptr.vmem [resolvable:$true] %s880_s10 }
 0x1ee   : > { %s1174_s20 = scalar_lea.vmem %s881_s10, 384 }
 0x1ef   : > { %p1175_p13 = scmp.ne.s32.totalorder %s881_s10, %s1174_s20 }
 0x1f0   : > { %669 = vperm.xlu0 %1117, %v666_v20   ;;  %604 = vrot.lane.b32.xlu1 %v1617_v19, %s1255_s14 }
 0x1f1   : > { %p1176_p7 = pnand %p1175_p13, %p1776_p1 }
 0x1f3   : > { %p1177_p5 = pneg %p1176_p7 }
 0x1f4   : > { %597 = vrot.lane.b32.xlu1 %v592_v8, %s1256_s17 }
 0x236   : > { %v652_v21 = vpop.permute.xlu0 %651  ;;  %v661_v22 = vpop.permute.xlu1 %660 }
 0x23a   : > { %v634_v23 = vpop.permute.xlu0 %633  ;;  %v643_v24 = vpop.permute.xlu1 %642 }
 0x23e   : > { %v625_v25 = vpop.permute.xlu0 %624  ;;  %v616_v26 = vpop.permute.xlu1 %615 }
 0x242   : > { %v657_v27 = vpop.permute.xlu0 %656  ;;  %v648_v28 = vpop.permute.xlu1 %647 }
 0x243   : > { %v664_v29 = vsel %vm415_vm1, %v661_v22, %v657_v27  ;;  %v655_v30 = vsel %vm405_vm2, %v652_v21, %v648_v28 }
 0x244   : > { %1028 = vmatpush3.msra.mxu1 %v664_v29 }
 0x245   : > { %1029 = vmatprep.subr.mxu1 %v1246_v0 }
 0x246   : > { %v639_v31 = vpop.permute.xlu0 %638  ;;  %1030 = vmatpush3.msra.mxu1 %v655_v30  ;;  %v630_v32 = vpop.permute.xlu1 %629 }
 0x247   : > { %v646_v33 = vsel %vm395_vm3, %v643_v24, %v639_v31  ;;  %1031 = vmatprep.subr.mxu1 %v1246_v0  ;;  %v637_v34 = vsel %vm385_vm4, %v634_v23, %v630_v32 }
 0x248   : > { %1032 = vmatpush3.msra.mxu1 %v646_v33 }
 0x249   : > { %1033 = vmatprep.subr.mxu1 %v1246_v0 }
 0x24a   : > { %v621_v35 = vpop.permute.xlu0 %620  ;;  %1034 = vmatpush3.msra.mxu1 %v637_v34  ;;  %v612_v36 = vpop.permute.xlu1 %611 }
 0x24b   : > { %1035 = vmatprep.subr.mxu1 %v1246_v0  ;;  %v628_v56 = vsel %vm375_vm5, %v625_v25, %v621_v35  ;;  %v619_v60 = vsel %vm365_vm6, %v616_v26, %v612_v36 }
 0x24c   : > { %1036 = vmatpush3.msra.mxu1 %v592_v8 }
 0x24d   : > { %1037 = vmatprep.subr.mxu1 %v1246_v0 }
 0x24e   : > { %v603_v37 = vpop.permute.xlu0 %602  ;;  %v659_v38 = vpop.permute.xlu1 %658 }
 0x24f   : > { %v663_v39 = vsel %vm415_vm1, %v657_v27, %v659_v38  ;;  %v662_v40 = vsel %vm415_vm1, %v659_v38, %v661_v22 }
 0x250   : > { %689 = vmatprep.subr.mxu0 %v662_v40 }
 0x251   : > { %690 = vmatpush1.msra.mxu0 %v663_v39 }
 0x252   : > { %v641_v41 = vpop.permute.xlu0 %640  ;;  %v650_v42 = vpop.permute.xlu1 %649 }
 0x253   : > { %v654_v43 = vsel %vm405_vm2, %v648_v28, %v650_v42  ;;  %v653_v44 = vsel %vm405_vm2, %v650_v42, %v652_v21  ;;  %v644_v45 = vsel %vm395_vm3, %v641_v41, %v643_v24  ;;  %v645_v46 = vsel %vm395_vm3, %v639_v31, %v641_v41 }
 0x254   : > { %691 = vmatprep.subr.mxu0 %v653_v44 }
 0x255   : > { %692 = vmatpush1.msra.mxu0 %v654_v43 }
 0x256   : > { %v607_v47 = vpop.permute.xlu0 %606  ;;  %693 = vmatprep.subr.mxu0 %v644_v45  ;;  %v594_v48 = vpop.permute.xlu1 %593 }
 0x257   : > { %694 = vmatpush1.msra.mxu0 %v645_v46  ;;  %v610_v5 = vsel %vm355_vm7, %v607_v47, %v603_v37 }
 0x25a   : > { %v632_v49 = vpop.permute.xlu1 %631  ;;  %v614_v52 = vpop.permute.xlu0 %613 }
 0x25b   : > { %v636_v50 = vsel %vm385_vm4, %v630_v32, %v632_v49  ;;  %v635_v51 = vsel %vm385_vm4, %v632_v49, %v634_v23  ;;  %v617_v57 = vsel %vm365_vm6, %v614_v52, %v616_v26  ;;  %v618_v59 = vsel %vm365_vm6, %v612_v36, %v614_v52 }
 0x25c   : > { %695 = vmatprep.subr.mxu0 %v635_v51 }
 0x25d   : > { %696 = vmatpush1.msra.mxu0 %v636_v50 }
 0x25e   : > { %697 = vmatprep.subr.mxu0 %v1617_v19  ;;  %v623_v53 = vpop.permute.xlu1 %622  ;;  %v596_v61 = vpop.permute.xlu0 %595 }
 0x25f   : > { %v626_v54 = vsel %vm375_vm5, %v623_v53, %v625_v25  ;;  %698 = vmatpush1.msra.mxu0 %v1600_v13  ;;  %v627_v55 = vsel %vm375_vm5, %v621_v35, %v623_v53  ;;  %v600_v8 = vsel %vm345_vm8, %v594_v48, %v596_v61  ;;  %v816_v13 = vld [vmem:[%s1438_s18] sm:$0x7]  ;;  %s1054_s18 = smul.u32 384, %s1319_s28  ;;  %s1257_s28 = smov [#allocation7]  }
 0x260   : > { %699 = vmatprep.subr.mxu0 %v627_v55  ;;  %1038 = vmatpush3.msra.mxu1 %v626_v54  ;;  %v821_v18 = vrot.slane %v816_v13, %v1593_v10  ;;  %v829_v19 = vrot.slane %v816_v13, %v1585_v58  ;;  %v825_v26 = vrot.slane %v816_v13, %v1606_v16  ;;  %s1178_s22 = sshll.u32 %s1257_s28, 4  ;;  %s1179_s22 = int_to_ptr.vmem [resolvable:$false] %s1178_s22 }
 0x261   : > { %700 = vmatpush1.msra.mxu0 %v628_v56  ;;  %1039 = vmatprep.subr.mxu1 %v1246_v0  ;;  %s878_s23 = scalar_lea.hbm %s1761_s7, %s1054_s18  ;;  %s1180_s29 = scalar_lea.vmem %s1179_s22, 768 }
 0x262   : > { %701 = vmatprep.subr.mxu0 %v618_v59  ;;  %1040 = vmatpush3.msra.mxu1 %v617_v57  ;;  %v605_v62 = vpop.permute.xlu1 %604  ;;  %p1181_p8 = scmp.lt.s32.totalorder %s881_s10, %s1179_s22  ;;  %p1182_p10 = scmp.lt.s32.totalorder %s1180_s29, %s1174_s20 }
 0x263   : > { %v608_v63 = vsel %vm355_vm7, %v605_v62, %v607_v47  ;;  %702 = vmatpush1.msra.mxu0 %v619_v60  ;;  %1041 = vmatprep.subr.mxu1 %v1246_v0  ;;  %v609_v4 = vsel %vm355_vm7, %v603_v37, %v605_v62 }
 0x264   : > { %703 = vmatprep.subr.mxu0 %v609_v4  ;;  %1042 = vmatpush3.msra.mxu1 %v608_v63  ;;  %p1183_p2 = por %p1182_p10, %p1181_p8 }
 0x265   : > { %704 = vmatpush1.msra.mxu0 %v610_v5  ;;  %1043 = vmatprep.subr.mxu1 %v1246_v0  ;;  %v836_v0 = vsub.f32 2.0, %v816_v13 }
 0x266   : > { %705 = vmatprep.subr.mxu0 %v600_v8  ;;  %v598_v9 = vpop.permute.xlu1 %597  ;;  %p1184_p4 = pnand %p1183_p2, %p1177_p5 }
 0x267   : > { %v599_v11 = vsel %vm345_vm8, %v596_v61, %v598_v9  ;;  %v601_v12 = vsel %vm345_vm8, %v598_v9, %v594_v48  ;;  %v841_v14 = vrot.slane %v836_v0, %v1593_v10  ;;  %v849_v15 = vrot.slane %v836_v0, %v1585_v58 }
 0x268   : > { %706 = vmatpush1.msra.mxu0 %v601_v12  ;;  %1044 = vmatpush3.msra.mxu1 %v599_v11  ;;  %v845_v7 = vrot.slane %v836_v0, %v1606_v16 }
 0x269   : > { %981 = vmatmul.mubr.msk.f32.vlgmr.msra.gmra.mxu0 %vm426_vm9, %v665_v6  ;;  %1046 = vmatmul.mubr.msk.f32.vlgmr.msra.gmra.mxu1 %vm426_vm9, %v665_v6  ;;  %v853_v21 = vmul.f32 %v841_v14, %v1448_v2  ;;  %v855_v25 = vmul.f32 %v849_v15, %v1454_v3 }
 0x26a   : > { %v854_v58 = vmul.f32 %v845_v7, %v1446_v1 }
 0x26b   : > { %v670_v17 = vpop.permute.xlu0 %669 }
 0x329   : > { %v741_v20 = vpop.f32.mrf.mxu0  ;;  %v812_v22 = vpop.f32.mrf.mxu1 }
 0x32a   : > { %v742_v23 = vadd.f32 %v741_v20, %v670_v17  ;;  %v813_v24 = vadd.f32 %v812_v22, %v670_v17 }
 0x32b   : > { %v743_v27 = vpop.f32.mrf.mxu0  ;;  %v1047_v28 = vpop.f32.mrf.mxu1 }
 0x32c   : > { %v833_v29 = vmul.f32 %v821_v18, %v742_v23  ;;  %v835_v10 = vmul.f32 %v829_v19, %v813_v24  ;;  %v744_v30 = vadd.f32 %v743_v27, %v670_v17 }
 0x32e   : > { %v856_v31 = vadd.f32 %v853_v21, %v833_v29  ;;  %v858_v32 = vadd.f32 %v855_v25, %v835_v10  ;;  %v834_v33 = vmul.f32 %v825_v26, %v744_v30 }
 0x330   : > { %v859_v2 = vmax.f32 %v856_v31, 0.0  ;;  %v861_v3 = vmax.f32 %v858_v32, 0.0  ;;  %v857_v34 = vadd.f32 %v854_v58, %v834_v33 }
 0x332   : > { %862 = vst [vmem:[%s332_s9] sm:$0xff] %v859_v2  ;;  %864 = vst [vmem:[%s332_s9 + $0x10] sm:$0xff] %v861_v3  ;;  %v860_v16 = vmax.f32 %v857_v34, 0.0 }
 0x334   : > { %863 = vst [vmem:[%s332_s9 + $0x8] sm:$0xff] %v860_v16 }
 0x335   : > { %1187 = shalt.err (!%p1184_p4)
}
 0x336   : > { %s1188_s16 = scalar_lea.hbm %s878_s23, 384  ;;  %s1192_s19 = scalar_lea.hbm %s1761_s7, 768 }
 0x337   : > { %p1189_p9 = scmp.ne.s32.totalorder %s878_s23, %s1188_s16  ;;  %p1193_p11 = scmp.lt.s32.totalorder %s878_s23, %s1761_s7 }
 0x338   : > { %p1194_p12 = scmp.lt.s32.totalorder %s1192_s19, %s1188_s16 }
 0x339   : > { %p1190_p0 = pnand %p1189_p9, %p1776_p1 }
 0x33a   : > { %p1195_p3 = por %p1194_p12, %p1193_p11 }
 0x33b   : > { %p1191_p6 = pneg %p1190_p0 }
 0x33d   : > { %p1196_p13 = pnand %p1195_p3, %p1191_p6 }
 0x33f   : > { %1199 = shalt.err (!%p1196_p13)
}
 0x340   : > { %1059 = dma.vmem_to_hbm [thread:$0]  (%p1776_p1), %s881_s10, 384, %s878_s23, %s866_s8  }
 0x341 PF: > { %s892_s18 = sand.u32 1, %s1230_s24   ;;  %p1777_p7 = scmp.ne.s32.totalorder %s1768_s13, 0 }
 0x342   : > { %p1778_p5 = scmp.ge.s32.totalorder %s1242_s27, 2  ;;  %s893_s9 = scalar_lea.sflag [#allocation4], %s892_s18 }
 0x344   : > { %p1069_p8 = pnand %p1778_p5, %p1777_p7 }
 0x346   : > { %p1070_p10 = pneg %p1069_p8 }
 0x348   : > { %1225 = dma.done.wait (%p1070_p10), %s893_s9, 384  }
 0x349   : > { %1227 = vsyncadd (%p1070_p10), %s893_s9, 4294966912  ;;  %s1779_s14 = sld [smem:[#allocation11_spill]]  ;;  %p23_p2 = scmp.ge.s32.totalorder %s1323_s30, 4  }
 0x34a   : > { %s1780_s24 = smov %s1234_s25  ;;  %s1781_s25 = smov %s1238_s26 }
 0x34b   : > { %s1783_s27 = smov %s1323_s30  ;;  %25 = sbr.rel (!%p23_p2) target bundleno = 9 (0x9), region = 106 }
 0x34f   : > { %s1782_s26 = smov %s1779_s14 }
 0x350   :  { %898 = vsyncpa [#allocation3], 1 }
 0x351   :  { %900 = vsyncpa [#allocation3 + $0x1], 1 }
 0x352   :  { %901 = vsyncpa [#allocation6], 1 }
 0x353   :  { %903 = vsyncpa [#allocation6 + $0x1], 1 }
 0x354   :  { %904 = vsyncpa [#allocation4], 1 }
 0x355   :  { %906 = vsyncpa [#allocation4 + $0x1], 1 }

</bundles_post_ra>
